<compile_context>
chip_gen: v7x
topology: tpu7x:2x2x1
jax: 0.10.0
libtpu: 0.0.40
codegen_flags: <defaults>
</compile_context>

<pallas_src>
import functools
import math

import jax
import jax.numpy as jnp
from jax import lax
from jax.experimental import pallas as pl
from jax.experimental.pallas import tpu as pltpu

LANES = 128
SUBLANES = 8
MAX_BLOCK_ROWS = 2048  # (2048, 128) f32 block = 1 MiB; 3 inputs x 2 buffers fits all gens


def _pu_partial_sums_kernel(pred_ref, pos_ref, unl_ref, o_ref, *,
                            total_n, mask_tail):
    """Accumulates 4 partial sums into o_ref: (4, 8, 128) f32.

    o_ref[0] = sum(logsigmoid(x) * pos_mask)
    o_ref[1] = sum(pos_mask)
    o_ref[2] = sum(sigmoid(x) * unl_mask)
    o_ref[3] = sum(unl_mask)
    (each still spread over an (8,128) vreg; final reduce happens outside)
    """
    i = pl.program_id(0)
    br = pred_ref.shape[0]  # static block rows (multiple of 8)

    @pl.when(i == 0)
    def _():
        o_ref[...] = jnp.zeros_like(o_ref)

    x = pred_ref[...].astype(jnp.float32)
    pm = pos_ref[...].astype(jnp.float32)
    um = unl_ref[...].astype(jnp.float32)

    if mask_tail:
        # Ragged last grid block: rows past the real array hold garbage.
        # Mask against the (static) true element count.
        row_ids = lax.broadcasted_iota(jnp.int32, (br, LANES), 0)
        lane_ids = lax.broadcasted_iota(jnp.int32, (br, LANES), 1)
        idx = i * (br * LANES) + row_ids * LANES + lane_ids
        valid = idx < total_n
        x = jnp.where(valid, x, 0.0)
        pm = jnp.where(valid, pm, 0.0)
        um = jnp.where(valid, um, 0.0)

    # Numerically stable logsigmoid / sigmoid with a single exp.
    t = jnp.exp(-jnp.abs(x))              # in (0, 1]
    log_sig = jnp.minimum(x, 0.0) - jnp.log1p(t)
    inv = 1.0 / (1.0 + t)
    sig = jnp.where(x >= 0.0, inv, t * inv)

    def fold(v):
        # (br,128) -> (br//8, 8, 128) is a layout-free view for f32 (8,128)
        # tiling; reducing over the leading axis is just VPU vector adds.
        return jnp.sum(v.reshape(br // SUBLANES, SUBLANES, LANES), axis=0)

    o_ref[0] += fold(log_sig * pm)
    o_ref[1] += fold(pm)
    o_ref[2] += fold(sig * um)
    o_ref[3] += fold(um)


def taylor_var_pu_loss_pf(pred, positive_mask, unlabeled_mask, order,
                          epoch=None):
    """Forward of TaylorVarPULossPf. `epoch` is unused (as in the PyTorch code)."""
    # --- glue (plain JAX, no dtype upcast, no full-size pad copy) -------------
    pos = jnp.expand_dims(positive_mask, 0)
    unl = jnp.expand_dims(unlabeled_mask, 0)
    shape = jnp.broadcast_shapes(pred.shape, pos.shape, unl.shape)
    pred_b = jnp.broadcast_to(pred, shape)
    pos_b = jnp.broadcast_to(pos, shape)
    unl_b = jnp.broadcast_to(unl, shape)

    n = math.prod(shape)
    row_tile = SUBLANES * LANES  # 1024: keeps rows a multiple of 8
    n_pad = pl.cdiv(n, row_tile) * row_tile
    rows = n_pad // LANES

    def prep(a):
        flat = a.reshape(-1)
        if n_pad != n:  # only pad when the layout-free reshape is impossible
            flat = jnp.pad(flat, (0, n_pad - n))
        return flat.reshape(rows, LANES)

    pred2, pos2, unl2 = prep(pred_b), prep(pos_b), prep(unl_b)

    block_rows = min(MAX_BLOCK_ROWS, rows)
    n_blocks = pl.cdiv(rows, block_rows)
    mask_tail = (rows % block_rows) != 0

    kernel = functools.partial(_pu_partial_sums_kernel,
                               total_n=n, mask_tail=mask_tail)
    in_spec = pl.BlockSpec((block_rows, LANES), lambda i: (i, 0))

    # --- hot path: Pallas kernel ----------------------------------------------
    parts = pl.pallas_call(
        kernel,
        out_shape=jax.ShapeDtypeStruct((4, SUBLANES, LANES), jnp.float32),
        grid_spec=pltpu.PrefetchScalarGridSpec(
            num_scalar_prefetch=0,
            grid=(n_blocks,),
            in_specs=[in_spec, in_spec, in_spec],
            out_specs=pl.BlockSpec((4, SUBLANES, LANES), lambda i: (0, 0, 0)),
        ),
        compiler_params=pltpu.CompilerParams(
            dimension_semantics=("arbitrary",)),
    )(pred2, pos2, unl2)

    # --- tiny scalar epilogue (4 KiB reduce + static Taylor series) -----------
    sums = jnp.sum(parts.reshape(4, -1), axis=1)
    positive_loss = -sums[0] / sums[1]
    exp_phi = sums[2] / sums[3]
    one_minus = jnp.float32(1.0) - exp_phi
    approx = jnp.float32(0.0)
    powv = jnp.float32(1.0)
    for k in range(1, order + 1):  # `order` is a static Python int
        powv = powv * one_minus
        approx = approx - powv / jnp.float32(k)
    unlabeled_loss = approx
    loss = unlabeled_loss + positive_loss
    return loss, positive_loss, unlabeled_loss


def _reference(pred, positive_mask, unlabeled_mask, order):
    positive_mask = jnp.expand_dims(positive_mask, 0).astype(jnp.float32)
    unlabeled_mask = jnp.expand_dims(unlabeled_mask, 0).astype(jnp.float32)
    log_sigmoid = jax.nn.log_sigmoid(pred.astype(jnp.float32))
    positive_loss = -(log_sigmoid * positive_mask).sum() / positive_mask.sum()
    exp_phi = (jnp.exp(log_sigmoid) * unlabeled_mask).sum() / unlabeled_mask.sum()
    approx = 0.0
    for i in range(1, order + 1):
        approx = approx - (1.0 - exp_phi) ** i / i
    unlabeled_loss = approx
    return unlabeled_loss + positive_loss, positive_loss, unlabeled_loss


if __name__ == "__main__":
    order = 4
    key = jax.random.PRNGKey(0)
    k_pred, k_mask = jax.random.split(key)

    # pred: (1, C, H, W) f32 logits; masks: (C, H, W), kept in bf16 (binary
    # 0/1 values are exact) to demonstrate reduced HBM traffic.
    C, H, W = 4, 32, 32
    pred = jax.random.normal(k_pred, (1, C, H, W), dtype=jnp.float32)
    pos_bits = jax.random.uniform(k_mask, (C, H, W)) < 0.3
    positive_mask = pos_bits.astype(jnp.bfloat16)
    unlabeled_mask = (~pos_bits).astype(jnp.bfloat16)

    loss, ploss, uloss = taylor_var_pu_loss_pf(
        pred, positive_mask, unlabeled_mask, order, epoch=0)
    jax.block_until_ready((loss, ploss, uloss))

    ref_loss, ref_ploss, ref_uloss = _reference(
        pred, positive_mask, unlabeled_mask, order)

    assert jnp.allclose(loss, ref_loss, rtol=1e-5, atol=1e-5), (loss, ref_loss)
    assert jnp.allclose(ploss, ref_ploss, rtol=1e-5, atol=1e-5), (ploss, ref_ploss)
    assert jnp.allclose(uloss, ref_uloss, rtol=1e-5, atol=1e-5), (uloss, ref_uloss)

    print("KERNEL_OK")
</pallas_src>

<mosaic_0001>
module attributes {stable_mosaic.version = 11 : i64} {
  func.func @_pu_partial_sums_kernel(%arg0: i32, %arg1: memref<32x128xf32, #tpu.memory_space<vmem>>, %arg2: memref<32x128xbf16, #tpu.memory_space<vmem>>, %arg3: memref<32x128xbf16, #tpu.memory_space<vmem>>, %arg4: memref<4x8x128xf32, #tpu.memory_space<vmem>>) attributes {dimension_semantics = [#tpu.dimension_semantics<arbitrary>], iteration_bounds = array<i64: 1>, scalar_prefetch = 0 : i64, scratch_operands = 0 : i64, tpu.core_type = #tpu.core_type<tc>, window_params = [{transform_indices = @transform_0, window_bounds = array<i64: 32, 128>}, {transform_indices = @transform_1, window_bounds = array<i64: 32, 128>}, {transform_indices = @transform_2, window_bounds = array<i64: 32, 128>}, {pipeline_mode = #tpu.pipeline_mode<synchronous>, transform_indices = @transform_3, window_bounds = array<i64: 4, 8, 128>}]} {
    %c0_i32 = arith.constant 0 : i32
    %0 = arith.cmpi eq, %arg0, %c0_i32 : i32
    %1 = arith.extui %0 : i1 to i32
    %c0_i32_0 = arith.constant 0 : i32
    %2 = arith.cmpi ne, %1, %c0_i32_0 : i32
    scf.if %2 {
      %cst_35 = arith.constant 0.000000e+00 : f32
      %58 = vector.broadcast %cst_35 : f32 to vector<4x8x128xf32>
      %c0_36 = arith.constant 0 : index
      %c0_37 = arith.constant 0 : index
      %c0_38 = arith.constant 0 : index
      %59 = vector.load %arg4[%c0_36, %c0_37, %c0_38] : memref<4x8x128xf32, #tpu.memory_space<vmem>>, vector<4x8x128xf32>
      tpu.vector_store %arg4[%c0_36, %c0_37, %c0_38], %58 {strides = array<i32>} : memref<4x8x128xf32, #tpu.memory_space<vmem>>, vector<4x8x128xf32>,
    } else {
    }
    %c0 = arith.constant 0 : index
    %c0_1 = arith.constant 0 : index
    %3 = vector.load %arg1[%c0, %c0_1] : memref<32x128xf32, #tpu.memory_space<vmem>>, vector<32x128xf32>
    %c0_2 = arith.constant 0 : index
    %c0_3 = arith.constant 0 : index
    %4 = vector.load %arg2[%c0_2, %c0_3] : memref<32x128xbf16, #tpu.memory_space<vmem>>, vector<32x128xbf16>
    %5 = arith.extf %4 : vector<32x128xbf16> to vector<32x128xf32>
    %c0_4 = arith.constant 0 : index
    %c0_5 = arith.constant 0 : index
    %6 = vector.load %arg3[%c0_4, %c0_5] : memref<32x128xbf16, #tpu.memory_space<vmem>>, vector<32x128xbf16>
    %7 = arith.extf %6 : vector<32x128xbf16> to vector<32x128xf32>
    %8 = math.absf %3 : vector<32x128xf32>
    %cst = arith.constant 0.000000e+00 : f32
    %9 = vector.broadcast %cst : f32 to vector<32x128xf32>
    %10 = arith.subf %9, %8 : vector<32x128xf32>
    %11 = math.exp %10 : vector<32x128xf32>
    %cst_6 = arith.constant 0.000000e+00 : f32
    %12 = vector.broadcast %cst_6 : f32 to vector<32x128xf32>
    %13 = arith.minimumf %3, %12 : vector<32x128xf32>
    %14 = math.log1p %11 : vector<32x128xf32>
    %15 = arith.subf %13, %14 : vector<32x128xf32>
    %cst_7 = arith.constant 1.000000e+00 : f32
    %16 = vector.broadcast %cst_7 : f32 to vector<32x128xf32>
    %17 = arith.addf %16, %11 : vector<32x128xf32>
    %cst_8 = arith.constant 1.000000e+00 : f32
    %18 = vector.broadcast %cst_8 : f32 to vector<32x128xf32>
    %19 = arith.divf %18, %17 : vector<32x128xf32>
    %cst_9 = arith.constant 0.000000e+00 : f32
    %20 = vector.broadcast %cst_9 : f32 to vector<32x128xf32>
    %21 = arith.cmpf oge, %3, %20 : vector<32x128xf32>
    %22 = arith.mulf %11, %19 : vector<32x128xf32>
    %23 = arith.select %21, %19, %22 : vector<32x128xi1>, vector<32x128xf32>
    %c0_10 = arith.constant 0 : index
    %c0_11 = arith.constant 0 : index
    %c0_12 = arith.constant 0 : index
    %24 = vector.load %arg4[%c0_10, %c0_11, %c0_12] : memref<4x8x128xf32, #tpu.memory_space<vmem>>, vector<1x8x128xf32>
    %25 = vector.shape_cast %24 : vector<1x8x128xf32> to vector<8x128xf32>
    %26 = arith.mulf %15, %5 : vector<32x128xf32>
    %27 = vector.shape_cast %26 : vector<32x128xf32> to vector<4x8x128xf32>
    %cst_13 = arith.constant dense<0.000000e+00> : vector<8x128xf32>
    %28 = vector.multi_reduction <add>, %27, %cst_13 [0] : vector<4x8x128xf32> to vector<8x128xf32>
    %29 = arith.addf %25, %28 : vector<8x128xf32>
    %c0_14 = arith.constant 0 : index
    %c0_15 = arith.constant 0 : index
    %c0_16 = arith.constant 0 : index
    %30 = vector.load %arg4[%c0_14, %c0_15, %c0_16] : memref<4x8x128xf32, #tpu.memory_space<vmem>>, vector<1x8x128xf32>
    %31 = vector.shape_cast %30 : vector<1x8x128xf32> to vector<8x128xf32>
    %32 = vector.shape_cast %29 : vector<8x128xf32> to vector<1x8x128xf32>
    tpu.vector_store %arg4[%c0_14, %c0_15, %c0_16], %32 {strides = array<i32>} : memref<4x8x128xf32, #tpu.memory_space<vmem>>, vector<1x8x128xf32>,
    %c1 = arith.constant 1 : index
    %c0_17 = arith.constant 0 : index
    %c0_18 = arith.constant 0 : index
    %33 = vector.load %arg4[%c1, %c0_17, %c0_18] : memref<4x8x128xf32, #tpu.memory_space<vmem>>, vector<1x8x128xf32>
    %34 = vector.shape_cast %33 : vector<1x8x128xf32> to vector<8x128xf32>
    %35 = vector.shape_cast %5 : vector<32x128xf32> to vector<4x8x128xf32>
    %cst_19 = arith.constant dense<0.000000e+00> : vector<8x128xf32>
    %36 = vector.multi_reduction <add>, %35, %cst_19 [0] : vector<4x8x128xf32> to vector<8x128xf32>
    %37 = arith.addf %34, %36 : vector<8x128xf32>
    %c1_20 = arith.constant 1 : index
    %c0_21 = arith.constant 0 : index
    %c0_22 = arith.constant 0 : index
    %38 = vector.load %arg4[%c1_20, %c0_21, %c0_22] : memref<4x8x128xf32, #tpu.memory_space<vmem>>, vector<1x8x128xf32>
    %39 = vector.shape_cast %38 : vector<1x8x128xf32> to vector<8x128xf32>
    %40 = vector.shape_cast %37 : vector<8x128xf32> to vector<1x8x128xf32>
    tpu.vector_store %arg4[%c1_20, %c0_21, %c0_22], %40 {strides = array<i32>} : memref<4x8x128xf32, #tpu.memory_space<vmem>>, vector<1x8x128xf32>,
    %c2 = arith.constant 2 : index
    %c0_23 = arith.constant 0 : index
    %c0_24 = arith.constant 0 : index
    %41 = vector.load %arg4[%c2, %c0_23, %c0_24] : memref<4x8x128xf32, #tpu.memory_space<vmem>>, vector<1x8x128xf32>
    %42 = vector.shape_cast %41 : vector<1x8x128xf32> to vector<8x128xf32>
    %43 = arith.mulf %23, %7 : vector<32x128xf32>
    %44 = vector.shape_cast %43 : vector<32x128xf32> to vector<4x8x128xf32>
    %cst_25 = arith.constant dense<0.000000e+00> : vector<8x128xf32>
    %45 = vector.multi_reduction <add>, %44, %cst_25 [0] : vector<4x8x128xf32> to vector<8x128xf32>
    %46 = arith.addf %42, %45 : vector<8x128xf32>
    %c2_26 = arith.constant 2 : index
    %c0_27 = arith.constant 0 : index
    %c0_28 = arith.constant 0 : index
    %47 = vector.load %arg4[%c2_26, %c0_27, %c0_28] : memref<4x8x128xf32, #tpu.memory_space<vmem>>, vector<1x8x128xf32>
    %48 = vector.shape_cast %47 : vector<1x8x128xf32> to vector<8x128xf32>
    %49 = vector.shape_cast %46 : vector<8x128xf32> to vector<1x8x128xf32>
    tpu.vector_store %arg4[%c2_26, %c0_27, %c0_28], %49 {strides = array<i32>} : memref<4x8x128xf32, #tpu.memory_space<vmem>>, vector<1x8x128xf32>,
    %c3 = arith.constant 3 : index
    %c0_29 = arith.constant 0 : index
    %c0_30 = arith.constant 0 : index
    %50 = vector.load %arg4[%c3, %c0_29, %c0_30] : memref<4x8x128xf32, #tpu.memory_space<vmem>>, vector<1x8x128xf32>
    %51 = vector.shape_cast %50 : vector<1x8x128xf32> to vector<8x128xf32>
    %52 = vector.shape_cast %7 : vector<32x128xf32> to vector<4x8x128xf32>
    %cst_31 = arith.constant dense<0.000000e+00> : vector<8x128xf32>
    %53 = vector.multi_reduction <add>, %52, %cst_31 [0] : vector<4x8x128xf32> to vector<8x128xf32>
    %54 = arith.addf %51, %53 : vector<8x128xf32>
    %c3_32 = arith.constant 3 : index
    %c0_33 = arith.constant 0 : index
    %c0_34 = arith.constant 0 : index
    %55 = vector.load %arg4[%c3_32, %c0_33, %c0_34] : memref<4x8x128xf32, #tpu.memory_space<vmem>>, vector<1x8x128xf32>
    %56 = vector.shape_cast %55 : vector<1x8x128xf32> to vector<8x128xf32>
    %57 = vector.shape_cast %54 : vector<8x128xf32> to vector<1x8x128xf32>
    tpu.vector_store %arg4[%c3_32, %c0_33, %c0_34], %57 {strides = array<i32>} : memref<4x8x128xf32, #tpu.memory_space<vmem>>, vector<1x8x128xf32>,
    return
  }
  func.func @transform_0(%arg0: i32) -> (i32, i32) {
    %c0_i32 = arith.constant 0 : i32
    %c0_i32_0 = arith.constant 0 : i32
    return %arg0, %c0_i32 : i32, i32
  }
  func.func @transform_1(%arg0: i32) -> (i32, i32) {
    %c0_i32 = arith.constant 0 : i32
    %c0_i32_0 = arith.constant 0 : i32
    return %arg0, %c0_i32 : i32, i32
  }
  func.func @transform_2(%arg0: i32) -> (i32, i32) {
    %c0_i32 = arith.constant 0 : i32
    %c0_i32_0 = arith.constant 0 : i32
    return %arg0, %c0_i32 : i32, i32
  }
  func.func @transform_3(%arg0: i32) -> (i32, i32, i32) {
    %c0_i32 = arith.constant 0 : i32
    %c0_i32_0 = arith.constant 0 : i32
    %c0_i32_1 = arith.constant 0 : i32
    %c0_i32_2 = arith.constant 0 : i32
    return %c0_i32, %c0_i32_0, %c0_i32_1 : i32, i32, i32
  }
}

</mosaic_0001>

<bundles_post_ra>
// kernel: tpu_custom_call.1
= control target key start
LH: loop header
LB: loop body
LE: loop exit
PB: predicated region body
PF: predicated region fallthrough
CT: control target
= control target key end

     0   :  { %8 = vsyncpa [#allocation3], 0  ;;  %s573_s0 = inlined_call_operand.hbm [shape: f32[32,128], index: 0, kind: input, shape index: {}]   ;;  %s574_s1 = inlined_call_operand.hbm [shape: bf16[32,128], index: 1, kind: input, shape index: {}]   ;;  %s575_s2 = inlined_call_operand.hbm [shape: bf16[32,128], index: 2, kind: input, shape index: {}]   ;;  %s576_s3 = inlined_call_operand.hbm [shape: f32[4,8,128], index: 3, kind: output, shape index: {}]  }
   0x1   :  { %9 = vsyncpa [#allocation6], 0 }
   0x2   :  { %10 = vsyncpa [#allocation4], 0  ;;  %s366_s12 = smov [#allocation5]   ;;  %s272_s16 = scalar_lea.hbm %s574_s1, 256 }
   0x3   :  { %s28_s13 = sshll.u32 %s366_s12, 4  ;;  %p273_p0 = scmp.ne.s32.totalorder %s574_s1, %s272_s16  ;;  %s29_s13 = int_to_ptr.vmem [resolvable:$true] %s28_s13 }
   0x4   :  { %p276_p1 = scmp.lt.u32.totalorder %s272_s16, %s574_s1 }
   0x6   :  { %p278_p2 = pnand %p276_p1, %p273_p0 }
   0x8   :  { %281 = shalt.err (!%p278_p2)
}
   0x9   :  { %s282_s21 = scalar_lea.vmem %s29_s13, 256  ;;  %p287_p4 = scmp.lt.s32.totalorder %s29_s13, %s29_s13 }
   0xa   :  { %p283_p3 = scmp.ne.s32.totalorder %s29_s13, %s282_s21  ;;  %p288_p5 = scmp.lt.s32.totalorder %s282_s21, %s282_s21 }
   0xc   :  { %p289_p6 = por %p288_p5, %p287_p4 }
   0xe   :  { %p290_p7 = pnand %p289_p6, %p283_p3 }
  0x10   :  { %293 = shalt.err (!%p290_p7)
}
  0x11   :  { %s367_s22 = smov 64   ;;  %s368_s23 = smov 4  }
  0x12   :  { %34 = dma.hbm_to_vmem [thread:$0]  %s574_s1, 256, %s29_s13, [#allocation6], %s367_s22, %s367_s22, %s368_s23  }
  0x13   :  { %s369_s26 = smov [#allocation2]   ;;  %s294_s30 = scalar_lea.hbm %s573_s0, 512 }
  0x14   :  { %s16_s27 = sshll.u32 %s369_s26, 4  ;;  %p295_p8 = scmp.ne.s32.totalorder %s573_s0, %s294_s30  ;;  %s17_s27 = int_to_ptr.vmem [resolvable:$true] %s16_s27 }
  0x15   :  { %p298_p9 = scmp.lt.u32.totalorder %s294_s30, %s573_s0 }
  0x17   :  { %p300_p10 = pnand %p298_p9, %p295_p8 }
  0x19   :  { %303 = shalt.err (!%p300_p10)
}
  0x1a   :  { %s304_s8 = scalar_lea.vmem %s17_s27, 512  ;;  %p309_p12 = scmp.lt.s32.totalorder %s17_s27, %s17_s27 }
  0x1b   :  { %p305_p11 = scmp.ne.s32.totalorder %s17_s27, %s304_s8  ;;  %p310_p13 = scmp.lt.s32.totalorder %s304_s8, %s304_s8 }
  0x1d   :  { %p311_p0 = por %p310_p13, %p309_p12 }
  0x1f   :  { %p312_p1 = pnand %p311_p0, %p305_p11 }
  0x21   :  { %315 = shalt.err (!%p312_p1)
}
  0x22   :  { %s370_s1 = smov 128   ;;  %s371_s9 = smov 8  }
  0x23   :  { %22 = dma.hbm_to_vmem [thread:$0]  %s573_s0, 512, %s17_s27, [#allocation3], %s370_s1, %s370_s1, %s371_s9  }
  0x24   :  { %s372_s12 = smov [#allocation7]   ;;  %s316_s16 = scalar_lea.hbm %s575_s2, 256 }
  0x25   :  { %s40_s13 = sshll.u32 %s372_s12, 4  ;;  %p317_p2 = scmp.ne.s32.totalorder %s575_s2, %s316_s16  ;;  %s41_s13 = int_to_ptr.vmem [resolvable:$true] %s40_s13 }
  0x26   :  { %p320_p3 = scmp.lt.u32.totalorder %s316_s16, %s575_s2 }
  0x28   :  { %p322_p4 = pnand %p320_p3, %p317_p2 }
  0x2a   :  { %325 = shalt.err (!%p322_p4)
}
  0x2b   :  { %s326_s21 = scalar_lea.vmem %s41_s13, 256  ;;  %p331_p6 = scmp.lt.s32.totalorder %s41_s13, %s41_s13 }
  0x2c   :  { %p327_p5 = scmp.ne.s32.totalorder %s41_s13, %s326_s21  ;;  %p332_p7 = scmp.lt.s32.totalorder %s326_s21, %s326_s21 }
  0x2e   :  { %p333_p8 = por %p332_p7, %p331_p6 }
  0x30   :  { %p334_p9 = pnand %p333_p8, %p327_p5 }
  0x32   :  { %337 = shalt.err (!%p334_p9)
}
  0x33   :  { %46 = dma.hbm_to_vmem [thread:$0]  %s575_s2, 256, %s41_s13, [#allocation6], %s367_s22, %s367_s22, %s368_s23  }
  0x34   :  { %360 = dma.done.wait [#allocation3], 512  }
  0x35   :  { %361 = vsyncadd [#allocation3], 4294966784 }
  0x36   :  { %362 = dma.done.wait [#allocation6], 512  }
  0x37   :  { %363 = vsyncadd [#allocation6], 4294966784  ;;  %v439_v0 = vld [vmem:[#allocation2] sm:$0xff]  ;;  %v441_v1 = vld [vmem:[#allocation2 + $0x8] sm:$0xff]  ;;  %s373_s2 = smov [#allocation8]  }
  0x38   :  { %v443_v2 = vld [vmem:[#allocation2 + $0x10] sm:$0xff]  ;;  %v445_v3 = vld [vmem:[#allocation2 + $0x18] sm:$0xff]  ;;  %v447_v4 = vld [vmem:[#allocation5] sm:$0xff]   ;;  %v84_v6 = vand.u32 2147483647, %v439_v0  ;;  %v100_v55 = vmin.f32 %v439_v0, 0.0 }
  0x39   :  { %v449_v5 = vld [vmem:[#allocation5 + $0x8] sm:$0xff]   ;;  %v223_v7 = vunpack.c.l.bf16 %v447_v4  ;;  %v453_v8 = vld [vmem:[#allocation7] sm:$0xff]   ;;  %v224_v9 = vunpack.c.h.bf16 %v447_v4  ;;  %v85_v10 = vand.u32 2147483647, %v441_v1  ;;  %v86_v11 = vand.u32 2147483647, %v443_v2 }
  0x3a   :  { %v87_v12 = vand.u32 2147483647, %v445_v3  ;;  %v227_v13 = vunpack.c.l.bf16 %v449_v5  ;;  %v88_v14 = vsub.f32 0.0, %v84_v6  ;;  %v228_v19 = vunpack.c.h.bf16 %v449_v5  ;;  %v467_v23 = vld [vmem:[#allocation7 + $0x8] sm:$0xff]   ;;  %s208_s22 = sshll.u32 %s373_s2, 4  ;;  %s209_s22 = int_to_ptr.vmem [resolvable:$true] %s208_s22 }
  0x3b   :  { %v89_v15 = vsub.f32 0.0, %v85_v10  ;;  %v90_v16 = vsub.f32 0.0, %v86_v11  ;;  %v180_v18 = vadd.f32 %v224_v9, %v223_v7  ;;  %v231_v21 = vunpack.c.l.bf16 %v453_v8  ;;  %s338_s23 = scalar_lea.vmem %s209_s22, 512  ;;  %p343_p11 = scmp.lt.s32.totalorder %s209_s22, %s209_s22 }
  0x3c   :  { %v91_v17 = vsub.f32 0.0, %v87_v12  ;;  %v92_v20 = vmul.f32 1.442695, %v88_v14  ;;  %v232_v22 = vunpack.c.h.bf16 %v453_v8  ;;  %v235_v29 = vunpack.c.l.bf16 %v467_v23  ;;  %p339_p10 = scmp.ne.s32.totalorder %s209_s22, %s338_s23  ;;  %p344_p12 = scmp.lt.s32.totalorder %s338_s23, %s338_s23 }
  0x3d   :  { %v94_v24 = vmul.f32 1.442695, %v89_v15  ;;  %v96_v25 = vmul.f32 1.442695, %v90_v16  ;;  %v181_v27 = vadd.f32 %v227_v13, %v180_v18  ;;  %v236_v31 = vunpack.c.h.bf16 %v467_v23 }
  0x3e   :  { %v98_v26 = vmul.f32 1.442695, %v91_v17  ;;  %248 = vpow2.f32 %v92_v20  ;;  %v198_v30 = vadd.f32 %v232_v22, %v231_v21  ;;  %v101_v60 = vmin.f32 %v441_v1, 0.0  ;;  %p345_p13 = por %p344_p12, %p343_p11 }
  0x3f   :  { %250 = vpow2.f32 %v94_v24  ;;  %v182_v28 = vadd.f32 %v228_v19, %v181_v27  ;;  %v102_v10 = vmin.f32 %v443_v2, 0.0  ;;  %v103_v14 = vmin.f32 %v445_v3, 0.0 }
  0x40   :  { %252 = vpow2.f32 %v96_v25  ;;  %v199_v32 = vadd.f32 %v235_v29, %v198_v30  ;;  %vm156_vm4 = vcmp.ge.f32.partialorder %v439_v0, 0.0  ;;  %vm157_vm5 = vcmp.ge.f32.partialorder %v441_v1, 0.0  ;;  %p346_p0 = pnand %p345_p13, %p339_p10 }
  0x41   :  { %254 = vpow2.f32 %v98_v26  ;;  %184 = vst [vmem:[#allocation8 + $0x8] sm:$0xff] %v182_v28  ;;  %vm158_vm6 = vcmp.ge.f32.partialorder %v443_v2, 0.0  ;;  %vm159_vm7 = vcmp.ge.f32.partialorder %v445_v3, 0.0 }
  0x42   :  { %v200_v33 = vadd.f32 %v236_v31, %v199_v32 }
  0x44   :  { %202 = vst [vmem:[#allocation8 + $0x18] sm:$0xff] %v200_v33 }
  0x48   :  { %v249_v34 = vpop.eup %248 }
  0x49   :  { %v483_v35 = vpop.eup %250  ;;  %v104_v36 = vadd.f32 1.0, %v249_v34  ;;  %v107_v41 = vmul.f32 -0.5, %v249_v34  ;;  %v110_v47 = vand.u32 2147483647, %v249_v34 }
  0x4a   :  { %v485_v37 = vpop.eup %252  ;;  %v113_v38 = vadd.f32 1.0, %v483_v35  ;;  %v116_v42 = vmul.f32 -0.5, %v483_v35  ;;  %v119_v49 = vand.u32 2147483647, %v483_v35 }
  0x4b   :  { %v488_v39 = vpop.eup %254  ;;  %256 = vlog2.f32 %v104_v36  ;;  %v122_v40 = vadd.f32 1.0, %v485_v37  ;;  %v125_v44 = vmul.f32 -0.5, %v485_v37  ;;  %v108_v45 = vadd.f32 1.0, %v107_v41 }
  0x4c   :  { %258 = vlog2.f32 %v113_v38  ;;  %v131_v43 = vadd.f32 1.0, %v488_v39  ;;  %v134_v46 = vmul.f32 -0.5, %v488_v39  ;;  %v117_v48 = vadd.f32 1.0, %v116_v42 }
  0x4d   :  { %260 = vlog2.f32 %v122_v40  ;;  %v126_v50 = vadd.f32 1.0, %v125_v44  ;;  %v128_v51 = vand.u32 2147483647, %v485_v37  ;;  %v109_v52 = vmul.f32 %v249_v34, %v108_v45 }
  0x4e   :  { %262 = vlog2.f32 %v131_v43  ;;  %v135_v53 = vadd.f32 1.0, %v134_v46  ;;  %vm498_vm0 = vcmp.lt.f32.partialorder %v110_v47, 0.0004427343  ;;  %v118_v57 = vmul.f32 %v483_v35, %v117_v48 }
  0x4f   :  { %264 = vrcp.f32 %v104_v36  ;;  %v137_v58 = vand.u32 2147483647, %v488_v39  ;;  %vm505_vm1 = vcmp.lt.f32.partialorder %v119_v49, 0.0004427343  ;;  %v127_v63 = vmul.f32 %v485_v37, %v126_v50 }
  0x50   :  { %266 = vrcp.f32 %v113_v38  ;;  %vm511_vm2 = vcmp.lt.f32.partialorder %v128_v51, 0.0004427343  ;;  %v136_v17 = vmul.f32 %v488_v39, %v135_v53 }
  0x51   :  { %268 = vrcp.f32 %v122_v40  ;;  %vm521_vm3 = vcmp.lt.f32.partialorder %v137_v58, 0.0004427343 }
  0x52   :  { %270 = vrcp.f32 %v131_v43 }
  0x55   :  { %v257_v54 = vpop.eup %256 }
  0x56   :  { %v259_v59 = vpop.eup %258  ;;  %v106_v61 = vmul.f32 0.6931472, %v257_v54 }
  0x57   :  { %v261_v6 = vpop.eup %260  ;;  %v115_v11 = vmul.f32 0.6931472, %v259_v59 }
  0x58   :  { %v112_v15 = vsel %vm498_vm0, %v109_v52, %v106_v61  ;;  %v124_v16 = vmul.f32 0.6931472, %v261_v6  ;;  %v263_v18 = vpop.eup %262 }
  0x59   :  { %v121_v20 = vsel %vm505_vm1, %v118_v57, %v115_v11  ;;  %v140_v25 = vsub.f32 %v100_v55, %v112_v15  ;;  %v265_v26 = vpop.eup %264  ;;  %v133_v28 = vmul.f32 0.6931472, %v263_v18 }
  0x5a   :  { %v130_v27 = vsel %vm511_vm2, %v127_v63, %v124_v16  ;;  %v141_v30 = vsub.f32 %v101_v60, %v121_v20  ;;  %v267_v32 = vpop.eup %266  ;;  %v160_v38 = vmul.f32 %v265_v26, %v249_v34 }
  0x5b   :  { %v142_v33 = vsub.f32 %v102_v10, %v130_v27  ;;  %v169_v36 = vmul.f32 %v223_v7, %v140_v25  ;;  %v269_v40 = vpop.eup %268  ;;  %v139_v41 = vsel %vm521_vm3, %v136_v17, %v133_v28  ;;  %v161_v43 = vmul.f32 %v267_v32, %v483_v35 }
  0x5c   :  { %v170_v42 = vmul.f32 %v224_v9, %v141_v30  ;;  %v271_v44 = vpop.eup %270  ;;  %v143_v45 = vsub.f32 %v103_v14, %v139_v41  ;;  %v162_v7 = vmul.f32 %v269_v40, %v485_v37  ;;  %v164_v34 = vsel %vm156_vm4, %v265_v26, %v160_v38 }
  0x5d   :  { %v171_v46 = vmul.f32 %v227_v13, %v142_v33  ;;  %v163_v48 = vmul.f32 %v271_v44, %v488_v39  ;;  %v165_v4 = vsel %vm157_vm5, %v267_v32, %v161_v43  ;;  %v187_v3 = vmul.f32 %v231_v21, %v164_v34 }
  0x5e   :  { %v173_v47 = vadd.f32 %v170_v42, %v169_v36  ;;  %v172_v9 = vmul.f32 %v228_v19, %v143_v45  ;;  %v166_v13 = vsel %vm158_vm6, %v269_v40, %v162_v7  ;;  %v188_v35 = vmul.f32 %v232_v22, %v165_v4 }
  0x5f   :  { %v167_v37 = vsel %vm159_vm7, %v271_v44, %v163_v48  ;;  %v189_v39 = vmul.f32 %v235_v29, %v166_v13 }
  0x60   :  { %v174_v0 = vadd.f32 %v173_v47, %v171_v46  ;;  %v190_v1 = vmul.f32 %v236_v31, %v167_v37  ;;  %v191_v49 = vadd.f32 %v188_v35, %v187_v3 }
  0x62   :  { %v175_v50 = vadd.f32 %v174_v0, %v172_v9  ;;  %v192_v21 = vadd.f32 %v191_v49, %v189_v39 }
  0x64   :  { %v193_v5 = vadd.f32 %v192_v21, %v190_v1  ;;  %177 = vst [vmem:[#allocation8] sm:$0xff] %v175_v50 }
  0x66   :  { %195 = vst [vmem:[#allocation8 + $0x10] sm:$0xff] %v193_v5 }
  0x67   :  { %349 = shalt.err (!%p346_p0)
}
  0x68   :  { %s350_s27 = scalar_lea.hbm %s576_s3, 512 }
  0x69   :  { %p351_p1 = scmp.ne.s32.totalorder %s576_s3, %s350_s27  ;;  %p354_p2 = scmp.lt.u32.totalorder %s350_s27, %s576_s3 }
  0x6b   :  { %p356_p3 = pnand %p354_p2, %p351_p1 }
  0x6d   :  { %359 = shalt.err (!%p356_p3)
}
  0x6e   :  { %214 = dma.vmem_to_hbm [thread:$0]  %s209_s22, 512, %s576_s3, [#allocation4], %s370_s1, %s370_s1, %s371_s9  }
  0x6f   :  { %364 = dma.done.wait [#allocation4], 512  }
  0x70   :  { %365 = vsyncadd [#allocation4], 4294966784 }
  0x71   :  { %218 = vsyncpa [#allocation3], 1 }
  0x72   :  { %219 = vsyncpa [#allocation6], 1 }
  0x73   :  { %220 = vsyncpa [#allocation4], 1 }

</bundles_post_ra>
